<compile_context>
chip_gen: v6e
topology: v6e:2x2x1
jax: 0.10.0
libtpu: 0.0.40
codegen_flags: <defaults>
</compile_context>

<pallas_src>
from functools import partial

import jax
import jax.numpy as jnp
from jax import lax
from jax.experimental import pallas as pl
from jax.experimental.pallas import tpu as pltpu


# ----------------------------------------------------------------------------------
# Kernel 1: neighbor gather + max over k  (== get_graph_feature + torch.max(dim=-1))
#   out[b, n, :] = max_j feat[b, idx[b, n, j], :]
# Gather is a single stacked one-hot matmul on the MXU (robust lowering on TPU).
# ----------------------------------------------------------------------------------
def _gather_max_kernel(idx_ref, feat_ref, out_ref, *, k):
    # idx_ref : (tq, k) int32 per-batch neighbor indices for this query tile
    # feat_ref: (N, Cf) f32 full feature slab for this batch
    # out_ref : (tq, Cf)
    feat = feat_ref[...]
    idx = idx_ref[...]                 # load once; slice the value (no per-j narrow loads)
    tq = idx.shape[0]
    n = feat.shape[0]

    col_ids = lax.broadcasted_iota(jnp.int32, (tq, n), 1)

    # Stack the k one-hot selection matrices along the row axis -> one MXU matmul
    # instead of k small ones (one weight push, one drain, k*tq rows).
    # TODO(synk): on v6e/v7x casting `oh`/`feat` to bf16 here (keeping
    # preferred_element_type=f32) would ~2x MXU rate at the cost of bf16-rounded values.
    oh = jnp.concatenate(
        [(col_ids == idx[:, j:j + 1]).astype(feat.dtype) for j in range(k)], axis=0)
    g = jnp.dot(oh, feat, preferred_element_type=jnp.float32)       # (k*tq, Cf)

    # max over the k stacked gathers (cheap elementwise VPU maxes over static slices)
    res = g[0:tq]
    for j in range(1, k):
        res = jnp.maximum(res, g[j * tq:(j + 1) * tq])
    out_ref[...] = res.astype(out_ref.dtype)


def _pick_query_tile(n, k, target=128, onehot_budget_bytes=4 * 1024 * 1024):
    """Largest query tile <= target dividing n whose stacked one-hot (k*tq, N) f32
    stays inside a fixed VMEM budget (bounds live VMEM for large N / large k)."""
    for t in (target, 64, 32, 16, 8):
        if t <= n and n % t == 0 and k * t * n * 4 <= onehot_budget_bytes:
            return t
    return n


def neighbor_max_pool(feat_bnc, idx_bnk):
    """feat (B, N, Cf) f32, idx (B, N, k) int32 per-batch indices -> (B, N, Cf)."""
    b, n, cf = feat_bnc.shape
    k = idx_bnk.shape[-1]
    tq = _pick_query_tile(n, k)
    return pl.pallas_call(
        partial(_gather_max_kernel, k=k),
        out_shape=jax.ShapeDtypeStruct((b, n, cf), feat_bnc.dtype),
        grid=(b, n // tq),
        in_specs=[pl.BlockSpec((None, tq, k), lambda i, q: (i, q, 0)),
                  pl.BlockSpec((None, n, cf), lambda i, q: (i, 0, 0))],
        out_specs=pl.BlockSpec((None, tq, cf), lambda i, q: (i, q, 0)),
        compiler_params=pltpu.CompilerParams(
            dimension_semantics=("parallel", "parallel"),
            vmem_limit_bytes=32 * 1024 * 1024),
    )(idx_bnk, feat_bnc)


# ----------------------------------------------------------------------------------
# Kernel 2: farthest point sampling + gather of vertices / pooled features
# (== farthest_point_sample + both index_points calls, fused).
# Phase 1 (sequential, m steps): lane-dense (1, N) distance / first-argmax state only;
#   the selected index is recorded into a (m, 1) VMEM scratch with a dynamic row store.
# Phase 2 (once): one (m, N) x (N, Cv+Cf) one-hot matmul gathers all selected rows of
#   [vertices | pooled features] and writes the whole output tile in one go.
# ----------------------------------------------------------------------------------
def _fps_pool_kernel(start_ref, vert_vn_ref, vfcat_ref, out_ref, idx_scr, *, m):
    b = pl.program_id(0)
    vert_vn = vert_vn_ref[...]                                    # (Cv, N) lane-dense coords
    cv, n = vert_vn.shape

    lane_ids = lax.broadcasted_iota(jnp.int32, (1, n), 1)         # (1, N)  (hoisted)
    start = start_ref[b]                                          # scalar int32 (SMEM)
    dist0 = jnp.full((1, n), 1e10, dtype=jnp.float32)             # torch inits 1e10
    far0 = jnp.full((1, 1), start, dtype=jnp.int32)

    # TODO(synk): original torch farthest_point_sample hardcodes .view(B, 1, 128) for the
    # centroid (only valid when coord dim == 128); we implement the intended broadcast
    # over the actual coordinate dimension instead.
    def body(i, carry):
        dist, far = carry
        idx_scr[pl.ds(i, 1), :] = far                             # record selected index

        # exact gather of the selected coordinates (one-hot mul + lane reduce, no MXU)
        oh = (lane_ids == far).astype(jnp.float32)                # (1, N)
        vsel_col = jnp.sum(vert_vn * oh, axis=1, keepdims=True)   # (Cv, 1)

        # lane-dense distance update: d[n] = sum_c (vert[c,n] - centroid[c])^2
        d = jnp.sum((vert_vn - vsel_col) ** 2, axis=0, keepdims=True)   # (1, N)
        dist = jnp.minimum(dist, d)

        # first-argmax over lanes (torch tie rule)
        maxv = jnp.max(dist, axis=1, keepdims=True)                     # (1, 1)
        far = jnp.min(jnp.where(dist == maxv, lane_ids, n),
                      axis=1, keepdims=True).astype(jnp.int32)          # (1, 1)
        return dist, far

    lax.fori_loop(0, m, body, (dist0, far0))

    # Phase 2: gather all m selected rows of [vertices | pooled features] with one matmul
    sel = idx_scr[...]                                            # (m, 1) int32
    row_ids = lax.broadcasted_iota(jnp.int32, (m, n), 1)          # (m, N)
    oh_all = (row_ids == sel).astype(jnp.float32)                 # (m, N) one-hot rows
    g = jnp.dot(oh_all, vfcat_ref[...], preferred_element_type=jnp.float32)   # (m, Cv+Cf)
    out_ref[...] = g.astype(out_ref.dtype)


def fps_pool(vert_vn, vfcat, start_idx, m):
    """vert_vn (B,Cv,N), vfcat (B,N,Cv+Cf), start (B,) -> (B, M, Cv+Cf)."""
    b, cv, n = vert_vn.shape
    c_all = vfcat.shape[-1]
    grid_spec = pltpu.PrefetchScalarGridSpec(
        num_scalar_prefetch=1,
        grid=(b,),
        in_specs=[pl.BlockSpec((None, cv, n), lambda i, s: (i, 0, 0)),
                  pl.BlockSpec((None, n, c_all), lambda i, s: (i, 0, 0))],
        out_specs=pl.BlockSpec((None, m, c_all), lambda i, s: (i, 0, 0)),
        scratch_shapes=[pltpu.VMEM((m, 1), jnp.int32)],
    )
    return pl.pallas_call(
        partial(_fps_pool_kernel, m=m),
        out_shape=jax.ShapeDtypeStruct((b, m, c_all), vfcat.dtype),
        grid_spec=grid_spec,
        compiler_params=pltpu.CompilerParams(
            dimension_semantics=("parallel",)),   # batch iterations independent -> both TCs on v7x
    )(start_idx, vert_vn, vfcat)


# ----------------------------------------------------------------------------------
# Wrapper reproducing Pooling_fps.forward
# ----------------------------------------------------------------------------------
def pooling_fps_forward(vertices, feature_map, idx, *, pooling_rate, neighbor_num, start_key):
    """vertices (B, 3, N), feature_map (B, C, N), idx flat (B*N*k,) global (batch-offset) indices.
    Returns (vertices_pool (B, 3, M), feature_map_pool (B, C, M)), M = int(N / pooling_rate)."""
    b, cv, n = vertices.shape
    k = neighbor_num
    m = int(n / pooling_rate)

    vert_vn = vertices.astype(jnp.float32)                               # (B, Cv, N) lane-dense
    vert_nc = jnp.transpose(vertices, (0, 2, 1)).astype(jnp.float32)     # (B, N, Cv)
    feat_nc = jnp.transpose(feature_map, (0, 2, 1)).astype(jnp.float32)  # (B, N, Cf)

    # torch's get_graph_feature indexes a (B*N, C) flat view: recover per-batch indices.
    idx_local = (jnp.asarray(idx).reshape(b, n, k) % n).astype(jnp.int32)

    pooled = neighbor_max_pool(feat_nc, idx_local)                       # (B, N, Cf)

    # torch uses torch.randint for the FPS seed point; deterministic here via PRNGKey.
    start = jax.random.randint(start_key, (b,), 0, n, dtype=jnp.int32)

    # concat [vertices | pooled features] along channels so one matmul gathers both
    vfcat = jnp.concatenate([vert_nc, pooled], axis=-1)                  # (B, N, Cv+Cf)
    out = fps_pool(vert_vn, vfcat, start, m)                             # (B, M, Cv+Cf)

    vpool = out[:, :, :cv]                                               # (B, M, Cv)
    fpool = out[:, :, cv:]                                               # (B, M, Cf)
    return jnp.transpose(vpool, (0, 2, 1)), jnp.transpose(fpool, (0, 2, 1))


if __name__ == "__main__":
    key = jax.random.PRNGKey(0)
    k_v, k_f, k_s = jax.random.split(key, 3)

    B, N, CF, K = 2, 64, 32, 8
    POOLING_RATE = 4

    vertices = jax.random.normal(k_v, (B, 3, N), dtype=jnp.float32)
    feature_map = jax.random.normal(k_f, (B, CF, N), dtype=jnp.float32)

    # The caller supplies `idx` in the torch API; build it the standard way
    # (k-NN on feature_map, flattened with batch offsets) in plain JAX glue.
    xx = jnp.sum(feature_map * feature_map, axis=1, keepdims=True)          # (B,1,N)
    inner = -2.0 * jnp.einsum("bcn,bcm->bnm", feature_map, feature_map)
    pairwise = -jnp.transpose(xx, (0, 2, 1)) - inner - xx                   # (B,N,N)
    knn_idx = lax.top_k(pairwise, K)[1]                                     # (B,N,K)
    idx_flat = (knn_idx + jnp.arange(B)[:, None, None] * N).reshape(-1)     # (B*N*K,)

    vpool, fpool = pooling_fps_forward(
        vertices, feature_map, idx_flat,
        pooling_rate=POOLING_RATE, neighbor_num=K, start_key=k_s)
    jax.block_until_ready((vpool, fpool))

    M = N // POOLING_RATE
    assert vpool.shape == (B, 3, M) and vpool.dtype == jnp.float32
    assert fpool.shape == (B, CF, M) and fpool.dtype == jnp.float32

    # ---- pure-JAX reference checks (loose tolerances: MXU f32 matmul passes) ----
    feat_t = jnp.transpose(feature_map, (0, 2, 1))          # (B, N, CF)
    vert_t = jnp.transpose(vertices, (0, 2, 1))             # (B, N, 3)
    idx_local = (knn_idx % N).astype(jnp.int32)

    pooled = neighbor_max_pool(feat_t, idx_local)
    pooled_ref = jax.vmap(lambda f, ii: f[ii])(feat_t, idx_local).max(axis=2)
    assert jnp.allclose(pooled, pooled_ref, rtol=1e-2, atol=1e-2)

    start = jax.random.randint(k_s, (B,), 0, N, dtype=jnp.int32)

    def fps_ref_one(xyz, s):
        def body(i, carry):
            dist, far, cent = carry
            cent = cent.at[i].set(far)
            c = xyz[far]
            d = jnp.sum((xyz - c) ** 2, axis=-1)
            dist = jnp.minimum(dist, d)
            far = jnp.argmax(dist).astype(jnp.int32)
            return dist, far, cent
        dist0 = jnp.full((xyz.shape[0],), 1e10, jnp.float32)
        cent0 = jnp.zeros((M,), jnp.int32)
        return lax.fori_loop(0, M, body, (dist0, s, cent0))[2]

    cent = jax.vmap(fps_ref_one)(vert_t, start)                              # (B, M)
    vpool_ref = jnp.take_along_axis(vert_t, cent[:, :, None], axis=1)        # (B, M, 3)
    fpool_ref = jnp.take_along_axis(pooled_ref, cent[:, :, None], axis=1)    # (B, M, CF)
    assert jnp.allclose(vpool, jnp.transpose(vpool_ref, (0, 2, 1)), rtol=1e-2, atol=1e-2)
    assert jnp.allclose(fpool, jnp.transpose(fpool_ref, (0, 2, 1)), rtol=1e-2, atol=1e-2)

    print("KERNEL_OK")
</pallas_src>

<mosaic_0001>
module attributes {stable_mosaic.version = 11 : i64} {
  func.func @_gather_max_kernel(%arg0: i32, %arg1: i32, %arg2: memref<1x64x8xi32, #tpu.memory_space<vmem>>, %arg3: memref<1x64x32xf32, #tpu.memory_space<vmem>>, %arg4: memref<1x64x32xf32, #tpu.memory_space<vmem>>) attributes {dimension_semantics = [#tpu.dimension_semantics<parallel>, #tpu.dimension_semantics<parallel>], iteration_bounds = array<i64: 2, 1>, scalar_prefetch = 0 : i64, scratch_operands = 0 : i64, tpu.core_type = #tpu.core_type<tc>, window_params = [{transform_indices = @transform_0, window_bounds = array<i64: 1, 64, 8>}, {transform_indices = @transform_1, window_bounds = array<i64: 1, 64, 32>}, {transform_indices = @transform_2, window_bounds = array<i64: 1, 64, 32>}]} {
    %c0 = arith.constant 0 : index
    %c0_0 = arith.constant 0 : index
    %c0_1 = arith.constant 0 : index
    %0 = vector.load %arg3[%c0, %c0_0, %c0_1] : memref<1x64x32xf32, #tpu.memory_space<vmem>>, vector<1x64x32xf32>
    %1 = vector.shape_cast %0 : vector<1x64x32xf32> to vector<64x32xf32>
    %c0_2 = arith.constant 0 : index
    %c0_3 = arith.constant 0 : index
    %c0_4 = arith.constant 0 : index
    %2 = vector.load %arg2[%c0_2, %c0_3, %c0_4] : memref<1x64x8xi32, #tpu.memory_space<vmem>>, vector<1x64x8xi32>
    %3 = vector.shape_cast %2 : vector<1x64x8xi32> to vector<64x8xi32>
    %4 = tpu.iota {dimensions = array<i32: 1>} : vector<64x64xi32>
    %5 = vector.extract_strided_slice %3 {offsets = [0, 0], sizes = [64, 1], strides = [1, 1]} : vector<64x8xi32> to vector<64x1xi32>
    %6 = vector.broadcast %5 : vector<64x1xi32> to vector<64x64xi32>
    %7 = arith.cmpi eq, %4, %6 : vector<64x64xi32>
    %8 = arith.extui %7 : vector<64x64xi1> to vector<64x64xi32>
    %9 = arith.sitofp %8 : vector<64x64xi32> to vector<64x64xf32>
    %10 = vector.extract_strided_slice %3 {offsets = [0, 1], sizes = [64, 1], strides = [1, 1]} : vector<64x8xi32> to vector<64x1xi32>
    %11 = vector.broadcast %10 : vector<64x1xi32> to vector<64x64xi32>
    %12 = arith.cmpi eq, %4, %11 : vector<64x64xi32>
    %13 = arith.extui %12 : vector<64x64xi1> to vector<64x64xi32>
    %14 = arith.sitofp %13 : vector<64x64xi32> to vector<64x64xf32>
    %15 = vector.extract_strided_slice %3 {offsets = [0, 2], sizes = [64, 1], strides = [1, 1]} : vector<64x8xi32> to vector<64x1xi32>
    %16 = vector.broadcast %15 : vector<64x1xi32> to vector<64x64xi32>
    %17 = arith.cmpi eq, %4, %16 : vector<64x64xi32>
    %18 = arith.extui %17 : vector<64x64xi1> to vector<64x64xi32>
    %19 = arith.sitofp %18 : vector<64x64xi32> to vector<64x64xf32>
    %20 = vector.extract_strided_slice %3 {offsets = [0, 3], sizes = [64, 1], strides = [1, 1]} : vector<64x8xi32> to vector<64x1xi32>
    %21 = vector.broadcast %20 : vector<64x1xi32> to vector<64x64xi32>
    %22 = arith.cmpi eq, %4, %21 : vector<64x64xi32>
    %23 = arith.extui %22 : vector<64x64xi1> to vector<64x64xi32>
    %24 = arith.sitofp %23 : vector<64x64xi32> to vector<64x64xf32>
    %25 = vector.extract_strided_slice %3 {offsets = [0, 4], sizes = [64, 1], strides = [1, 1]} : vector<64x8xi32> to vector<64x1xi32>
    %26 = vector.broadcast %25 : vector<64x1xi32> to vector<64x64xi32>
    %27 = arith.cmpi eq, %4, %26 : vector<64x64xi32>
    %28 = arith.extui %27 : vector<64x64xi1> to vector<64x64xi32>
    %29 = arith.sitofp %28 : vector<64x64xi32> to vector<64x64xf32>
    %30 = vector.extract_strided_slice %3 {offsets = [0, 5], sizes = [64, 1], strides = [1, 1]} : vector<64x8xi32> to vector<64x1xi32>
    %31 = vector.broadcast %30 : vector<64x1xi32> to vector<64x64xi32>
    %32 = arith.cmpi eq, %4, %31 : vector<64x64xi32>
    %33 = arith.extui %32 : vector<64x64xi1> to vector<64x64xi32>
    %34 = arith.sitofp %33 : vector<64x64xi32> to vector<64x64xf32>
    %35 = vector.extract_strided_slice %3 {offsets = [0, 6], sizes = [64, 1], strides = [1, 1]} : vector<64x8xi32> to vector<64x1xi32>
    %36 = vector.broadcast %35 : vector<64x1xi32> to vector<64x64xi32>
    %37 = arith.cmpi eq, %4, %36 : vector<64x64xi32>
    %38 = arith.extui %37 : vector<64x64xi1> to vector<64x64xi32>
    %39 = arith.sitofp %38 : vector<64x64xi32> to vector<64x64xf32>
    %40 = vector.extract_strided_slice %3 {offsets = [0, 7], sizes = [64, 1], strides = [1, 1]} : vector<64x8xi32> to vector<64x1xi32>
    %41 = vector.broadcast %40 : vector<64x1xi32> to vector<64x64xi32>
    %42 = arith.cmpi eq, %4, %41 : vector<64x64xi32>
    %43 = arith.extui %42 : vector<64x64xi1> to vector<64x64xi32>
    %44 = arith.sitofp %43 : vector<64x64xi32> to vector<64x64xf32>
    %45 = tpu.concatenate %9, %14, %19, %24, %29, %34, %39, %44 in 0 : vector<64x64xf32>, vector<64x64xf32>, vector<64x64xf32>, vector<64x64xf32>, vector<64x64xf32>, vector<64x64xf32>, vector<64x64xf32>, vector<64x64xf32> -> vector<512x64xf32>
    %cst = arith.constant dense<0.000000e+00> : vector<512x32xf32>
    %46 = tpu.matmul %45, %1, %cst {dimension_numbers = #tpu.dot_dimension_numbers<[1], [0], [0], [1], [0, 0, 1, 1], [], []>} : vector<512x64xf32>, vector<64x32xf32>, vector<512x32xf32> -> vector<512x32xf32>
    %47 = vector.extract_strided_slice %46 {offsets = [0, 0], sizes = [64, 32], strides = [1, 1]} : vector<512x32xf32> to vector<64x32xf32>
    %48 = vector.extract_strided_slice %46 {offsets = [64, 0], sizes = [64, 32], strides = [1, 1]} : vector<512x32xf32> to vector<64x32xf32>
    %49 = arith.maximumf %47, %48 : vector<64x32xf32>
    %50 = vector.extract_strided_slice %46 {offsets = [128, 0], sizes = [64, 32], strides = [1, 1]} : vector<512x32xf32> to vector<64x32xf32>
    %51 = arith.maximumf %49, %50 : vector<64x32xf32>
    %52 = vector.extract_strided_slice %46 {offsets = [192, 0], sizes = [64, 32], strides = [1, 1]} : vector<512x32xf32> to vector<64x32xf32>
    %53 = arith.maximumf %51, %52 : vector<64x32xf32>
    %54 = vector.extract_strided_slice %46 {offsets = [256, 0], sizes = [64, 32], strides = [1, 1]} : vector<512x32xf32> to vector<64x32xf32>
    %55 = arith.maximumf %53, %54 : vector<64x32xf32>
    %56 = vector.extract_strided_slice %46 {offsets = [320, 0], sizes = [64, 32], strides = [1, 1]} : vector<512x32xf32> to vector<64x32xf32>
    %57 = arith.maximumf %55, %56 : vector<64x32xf32>
    %58 = vector.extract_strided_slice %46 {offsets = [384, 0], sizes = [64, 32], strides = [1, 1]} : vector<512x32xf32> to vector<64x32xf32>
    %59 = arith.maximumf %57, %58 : vector<64x32xf32>
    %60 = vector.extract_strided_slice %46 {offsets = [448, 0], sizes = [64, 32], strides = [1, 1]} : vector<512x32xf32> to vector<64x32xf32>
    %61 = arith.maximumf %59, %60 : vector<64x32xf32>
    %c0_5 = arith.constant 0 : index
    %c0_6 = arith.constant 0 : index
    %c0_7 = arith.constant 0 : index
    %62 = vector.load %arg4[%c0_5, %c0_6, %c0_7] : memref<1x64x32xf32, #tpu.memory_space<vmem>>, vector<1x64x32xf32>
    %63 = vector.shape_cast %62 : vector<1x64x32xf32> to vector<64x32xf32>
    %64 = vector.shape_cast %61 : vector<64x32xf32> to vector<1x64x32xf32>
    tpu.vector_store %arg4[%c0_5, %c0_6, %c0_7], %64 {strides = array<i32>} : memref<1x64x32xf32, #tpu.memory_space<vmem>>, vector<1x64x32xf32>,
    return
  }
  func.func @transform_0(%arg0: i32, %arg1: i32) -> (i32, i32, i32) {
    %c0_i32 = arith.constant 0 : i32
    %c0_i32_0 = arith.constant 0 : i32
    return %arg0, %arg1, %c0_i32 : i32, i32, i32
  }
  func.func @transform_1(%arg0: i32, %arg1: i32) -> (i32, i32, i32) {
    %c0_i32 = arith.constant 0 : i32
    %c0_i32_0 = arith.constant 0 : i32
    %c0_i32_1 = arith.constant 0 : i32
    return %arg0, %c0_i32, %c0_i32_0 : i32, i32, i32
  }
  func.func @transform_2(%arg0: i32, %arg1: i32) -> (i32, i32, i32) {
    %c0_i32 = arith.constant 0 : i32
    %c0_i32_0 = arith.constant 0 : i32
    return %arg0, %arg1, %c0_i32 : i32, i32, i32
  }
}

</mosaic_0001>

<bundles_post_ra>
// kernel: tpu_custom_call.1
= control target key start
LH: loop header
LB: loop body
LE: loop exit
PB: predicated region body
PF: predicated region fallthrough
CT: control target
= control target key end

     0   :  { %s1800_s9 = smov 0   ;;  %s1802_s10 = smov 0   ;;  %s2226_s0 = inlined_call_operand.vmem [shape: s32[2,64,8], index: 0, kind: input, shape index: {}]   ;;  %s2227_s1 = inlined_call_operand.vmem [shape: f32[2,64,32], index: 1, kind: input, shape index: {}]   ;;  %s2228_s2 = inlined_call_operand.vmem [shape: f32[2,64,32], index: 2, kind: output, shape index: {}]  }
   0x1   :  { %s1804_s11 = smov 0  }
   0x2 LB: > { %s24_s12 = sadd.s32 1, %s1770_s10  ;;  %p1351_p0 = scmp.ge.s32.totalorder %s1774_s11, 1  ;;  %s1774_s11 = sphi %s1804_s11, %s12_s11   ;;  %s1770_s10 = sphi %s1802_s10, %s2230_s10   ;;  %s1766_s9 = sphi %s1800_s9, %s2229_s9  }
   0x3   : > { %p26_p1 = scmp.ge.s32.totalorder %s24_s12, 2  ;;  %p143_p2 = scmp.lt.s32.totalorder %s1774_s11, 3 }
   0x5   : > { %s2232_s12 = smov (%p26_p1, %s24_s12), 0  ;;  %p144_p3 = pnand %p1351_p0, %p143_p2 }
   0x6   : > { %p179_p4 = scmp.lt.s32.totalorder (!%p144_p3), %s1766_s9, 1 }
   0x7   : > { %147 = sbr.rel (%p144_p3) target bundleno = 515 (0x203), region = 28 }
   0xc   : > { %v1776_v0 = vmov 0   ;;  %s2234_s9 = smov (!%p179_p4, %s1766_s9), 1  ;;  %v1777_v10 = vmov 4   ;;  %v1778_v18 = vmov 1   ;;  %v1779_v19 = vmov 5  }
   0xd   : > { %1725 = vset.pattern.permute.xlu1 %v1776_v0  ;;  %1724 = vset.pattern.permute.xlu0 %v1776_v0  ;;  %s1818_s13 = sshll.u32 %s2234_s9, 6  ;;  %v1780_v20 = vmov 2   ;;  %v1781_v21 = vmov 6   ;;  %v1782_v22 = vmov 3   ;;  %v1783_v23 = vmov 7  }
   0xe   : > { %s1824_s16 = scalar_lea.vmem %s2226_s0, %s1818_s13  ;;  %s1830_s19 = scalar_lea.vmem %s2227_s1, %s1818_s13  ;;  %v219_v24 = vlaneseq  ;;  %vm605_vm0 = vcmask 523264   ;;  %v1784_v28 = vmov 0.0  }
   0xf   : > { %v1833_v1 = vld [vmem:[%s1824_s16 + $0x10] sm:$0xff]  ;;  %v1836_v2 = vld [vmem:[%s1824_s16] sm:$0xff]  ;;  %v1841_v3 = vld [vmem:[%s1824_s16 + $0x18] sm:$0xff]  ;;  %s2180_s22 = scalar_lea.vmem %s2228_s2, %s1818_s13 }
  0x10   : > { %228 = vperm.xlu1 %1725, %v1833_v1   ;;  %222 = vperm.xlu0 %1724, %v1836_v2   ;;  %v1844_v4 = vld [vmem:[%s1824_s16 + $0x8] sm:$0xff]  ;;  %v210_v5 = vld [vmem:[%s1830_s19 + $0x38] sm:$0xff]  ;;  %v209_v6 = vld [vmem:[%s1830_s19 + $0x30] sm:$0xff]  ;;  %v1919_v25 = vand.u32 127, %v219_v24 }
  0x11   : > { %1563 = vmatprep.subr.mxu0 %v210_v5  ;;  %1675 = vmatprep.subr.mxu1 %v210_v5  ;;  %v208_v7 = vld [vmem:[%s1830_s19 + $0x28] sm:$0xff]  ;;  %v1852_v8 = vld [vmem:[%s1824_s16 + $0x20] sm:$0xff]  ;;  %v206_v12 = vld [vmem:[%s1830_s19 + $0x18] sm:$0xff] }
  0x12   : > { %1564 = vmatpush3.msra.mxu0 %v210_v5  ;;  %1683 = vmatpush3.msra.mxu1 %v210_v5  ;;  %v207_v9 = vld [vmem:[%s1830_s19 + $0x20] sm:$0xff]  ;;  %v1858_v11 = vld [vmem:[%s1824_s16 + $0x28] sm:$0xff]  ;;  %v205_v13 = vld [vmem:[%s1830_s19 + $0x10] sm:$0xff] }
  0x13   : > { %1565 = vmatprep.subr.mxu0 %v209_v6  ;;  %1676 = vmatprep.subr.mxu1 %v209_v6  ;;  %v1865_v14 = vld [vmem:[%s1824_s16 + $0x30] sm:$0xff]  ;;  %v204_v15 = vld [vmem:[%s1830_s19 + $0x8] sm:$0xff]  ;;  %v203_v16 = vld [vmem:[%s1830_s19] sm:$0xff] }
  0x14   : > { %231 = vperm.xlu1 %1725, %v1841_v3   ;;  %225 = vperm.xlu0 %1724, %v1844_v4   ;;  %v1872_v17 = vld [vmem:[%s1824_s16 + $0x38] sm:$0xff] }
  0x15   : > { %1566 = vmatpush3.msra.mxu0 %v209_v6  ;;  %1684 = vmatpush3.msra.mxu1 %v209_v6 }
  0x16   : > { %1567 = vmatprep.subr.mxu0 %v208_v7  ;;  %1677 = vmatprep.subr.mxu1 %v208_v7 }
  0x17   : > { %1568 = vmatpush3.msra.mxu0 %v208_v7  ;;  %1685 = vmatpush3.msra.mxu1 %v208_v7 }
  0x18   : > { %1726 = vset.pattern.permute.xlu1 %v1777_v10  ;;  %234 = vperm.xlu0 %1724, %v1852_v8  }
  0x19   : > { %414 = vperm.xlu1 %1726, %v1836_v2   ;;  %1569 = vmatprep.subr.mxu0 %v207_v9 }
  0x1a   : > { %1570 = vmatpush3.msra.mxu0 %v207_v9  ;;  %1678 = vmatprep.subr.mxu1 %v207_v9 }
  0x1b   : > { %1571 = vmatprep.subr.mxu0 %v206_v12  ;;  %1686 = vmatpush3.msra.mxu1 %v207_v9 }
  0x1c   : > { %237 = vperm.xlu0 %1724, %v1858_v11   ;;  %1572 = vmatpush3.msra.mxu0 %v206_v12 }
  0x1d   : > { %417 = vperm.xlu1 %1726, %v1844_v4   ;;  %1573 = vmatprep.subr.mxu0 %v205_v13 }
  0x1e   : > { %1574 = vmatpush3.msra.mxu0 %v205_v13  ;;  %1679 = vmatprep.subr.mxu1 %v206_v12 }
  0x1f   : > { %1575 = vmatprep.subr.mxu0 %v204_v15  ;;  %1687 = vmatpush3.msra.mxu1 %v206_v12 }
  0x20   : > { %240 = vperm.xlu0 %1724, %v1865_v14   ;;  %1576 = vmatpush3.msra.mxu0 %v204_v15 }
  0x21   : > { %420 = vperm.xlu1 %1726, %v1833_v1   ;;  %1577 = vmatprep.subr.mxu0 %v203_v16 }
  0x22   : > { %1578 = vmatpush3.msra.mxu0 %v203_v16  ;;  %1680 = vmatprep.subr.mxu1 %v205_v13 }
  0x23   : > { %1688 = vmatpush3.msra.mxu1 %v205_v13 }
  0x24   : > { %243 = vperm.xlu0 %1724, %v1872_v17   ;;  %1681 = vmatprep.subr.mxu1 %v204_v15 }
  0x25   : > { %423 = vperm.xlu1 %1726, %v1841_v3   ;;  %1689 = vmatpush3.msra.mxu1 %v204_v15 }
  0x26   : > { %1682 = vmatprep.subr.mxu1 %v203_v16 }
  0x27   : > { %1690 = vmatpush3.msra.mxu1 %v203_v16 }
  0x28   : > { %1728 = vset.pattern.permute.xlu0 %v1777_v10 }
  0x29   : > { %426 = vperm.xlu1 %1726, %v1852_v8   ;;  %429 = vperm.xlu0 %1728, %v1858_v11  }
  0x2d   : > { %1727 = vset.pattern.permute.xlu1 %v1778_v18  ;;  %1729 = vset.pattern.permute.xlu0 %v1778_v18 }
  0x2e   : > { %273 = vperm.xlu1 %1727, %v1844_v4   ;;  %270 = vperm.xlu0 %1729, %v1836_v2  }
  0x32   : > { %276 = vperm.xlu1 %1727, %v1833_v1   ;;  %279 = vperm.xlu0 %1729, %v1841_v3  }
  0x36   : > { %1730 = vset.pattern.permute.xlu1 %v1777_v10  ;;  %288 = vperm.xlu0 %1729, %v1865_v14  }
  0x37   : > { %432 = vperm.xlu1 %1730, %v1865_v14  }
  0x3a   : > { %1733 = vset.pattern.permute.xlu0 %v1779_v19 }
  0x3b   : > { %435 = vperm.xlu1 %1730, %v1872_v17   ;;  %462 = vperm.xlu0 %1733, %v1836_v2  }
  0x3f   : > { %1731 = vset.pattern.permute.xlu1 %v1778_v18  ;;  %471 = vperm.xlu0 %1733, %v1841_v3  }
  0x40   : > { %282 = vperm.xlu1 %1731, %v1852_v8  }
  0x43   : > { %480 = vperm.xlu0 %1733, %v1865_v14  }
  0x44   : > { %285 = vperm.xlu1 %1731, %v1858_v11  }
  0x47   : > { %1738 = vset.pattern.permute.xlu0 %v1780_v20 }
  0x48   : > { %1732 = vset.pattern.permute.xlu1 %v1779_v19  ;;  %321 = vperm.xlu0 %1738, %v1844_v4  }
  0x49   : > { %465 = vperm.xlu1 %1732, %v1844_v4  }
  0x4c   : > { %330 = vperm.xlu0 %1738, %v1852_v8  }
  0x4d   : > { %468 = vperm.xlu1 %1732, %v1833_v1  }
  0x50   : > { %339 = vperm.xlu0 %1738, %v1872_v17  }
  0x51   : > { %1734 = vset.pattern.permute.xlu1 %v1778_v18 }
  0x52   : > { %291 = vperm.xlu1 %1734, %v1872_v17  }
  0x54   : > { %1743 = vset.pattern.permute.xlu0 %v1781_v21 }
  0x55   : > { %513 = vperm.xlu0 %1743, %v1844_v4  }
  0x56   : > { %1735 = vset.pattern.permute.xlu1 %v1780_v20 }
  0x57   : > { %318 = vperm.xlu1 %1735, %v1836_v2  }
  0x59   : > { %522 = vperm.xlu0 %1743, %v1852_v8  }
  0x5b   : > { %1736 = vset.pattern.permute.xlu1 %v1779_v19 }
  0x5c   : > { %474 = vperm.xlu1 %1736, %v1852_v8  }
  0x5d   : > { %531 = vperm.xlu0 %1743, %v1872_v17  }
  0x60   : > { %477 = vperm.xlu1 %1736, %v1858_v11  }
  0x61   : > { %1747 = vset.pattern.permute.xlu0 %v1782_v22 }
  0x62   : > { %372 = vperm.xlu0 %1747, %v1833_v1  }
  0x64   : > { %1737 = vset.pattern.permute.xlu1 %v1780_v20 }
  0x65   : > { %324 = vperm.xlu1 %1737, %v1833_v1  }
  0x66   : > { %381 = vperm.xlu0 %1747, %v1858_v11  }
  0x69   : > { %327 = vperm.xlu1 %1737, %v1841_v3  }
  0x6a   : > { %1750 = vset.pattern.permute.xlu0 %v1783_v23 }
  0x6b   : > { %564 = vperm.xlu0 %1750, %v1833_v1  }
  0x6d   : > { %1739 = vset.pattern.permute.xlu1 %v1779_v19 }
  0x6e   : > { %483 = vperm.xlu1 %1739, %v1872_v17  }
  0x6f   : > { %570 = vperm.xlu0 %1750, %v1852_v8  }
  0x72   : > { %1740 = vset.pattern.permute.xlu1 %v1781_v21 }
  0x73   : > { %510 = vperm.xlu1 %1740, %v1836_v2   ;;  %576 = vperm.xlu0 %1750, %v1865_v14  }
  0x77   : > { %1741 = vset.pattern.permute.xlu1 %v1780_v20 }
  0x78   : > { %333 = vperm.xlu1 %1741, %v1858_v11  }
  0x7c   : > { %336 = vperm.xlu1 %1741, %v1865_v14  }
  0x80   : > { %1742 = vset.pattern.permute.xlu1 %v1781_v21 }
  0x81   : > { %516 = vperm.xlu1 %1742, %v1833_v1  }
  0x85   : > { %519 = vperm.xlu1 %1742, %v1841_v3  }
  0x89   : > { %1744 = vset.pattern.permute.xlu1 %v1782_v22 }
  0x8a   : > { %366 = vperm.xlu1 %1744, %v1836_v2  }
  0x8b   : > { %v229_v26 = vpop.permute.xlu1 %228  ;;  %v223_v27 = vpop.permute.xlu0 %222 }
  0x8c   : > { %vm245_vm1 = vcmp.eq.s32.totalorder %v1919_v25, %v223_v27  ;;  %vm247_vm2 = vcmp.eq.s32.totalorder %v1919_v25, %v229_v26 }
  0x8d   : > { %v1358_v29 = vsel %vm245_vm1, 1.0, %v1784_v28  ;;  %v1360_v33 = vsel %vm247_vm2, 1.0, %v1784_v28 }
  0x8e   : > { %369 = vperm.xlu1 %1744, %v1844_v4   ;;  %1579 = vmatprep.mubr.msk.f32.mxu0 %vm605_vm0, %v1358_v29 }
  0x8f   : > { %v232_v30 = vpop.permute.xlu1 %231  ;;  %v226_v31 = vpop.permute.xlu0 %225 }
  0x90   : > { %vm246_vm3 = vcmp.eq.s32.totalorder %v1919_v25, %v226_v31  ;;  %vm248_vm4 = vcmp.eq.s32.totalorder %v1919_v25, %v232_v30 }
  0x91   : > { %v1359_v32 = vsel %vm246_vm3, 1.0, %v1784_v28  ;;  %v1361_v36 = vsel %vm248_vm4, 1.0, %v1784_v28 }
  0x92   : > { %1745 = vset.pattern.permute.xlu1 %v1781_v21  ;;  %1580 = vmatmul.mubr.msk.f32.vlgmr.msra.gmra.mxu0 %vm605_vm0, %v1359_v32 }
  0x93   : > { %525 = vperm.xlu1 %1745, %v1858_v11   ;;  %1582 = vmatprep.mubr.msk.f32.mxu0 %vm605_vm0, %v1360_v33  ;;  %v235_v34 = vpop.permute.xlu0 %234 }
  0x94   : > { %v415_v35 = vpop.permute.xlu1 %414  ;;  %vm249_vm5 = vcmp.eq.s32.totalorder %v1919_v25, %v235_v34 }
  0x95   : > { %vm437_vm6 = vcmp.eq.s32.totalorder %v1919_v25, %v415_v35  ;;  %v1362_v37 = vsel %vm249_vm5, 1.0, %v1784_v28 }
  0x96   : > { %1583 = vmatmul.mubr.msk.f32.gmra.mxu0 %vm605_vm0, %v1361_v36  ;;  %v1390_v38 = vsel %vm437_vm6, 1.0, %v1784_v28 }
  0x97   : > { %528 = vperm.xlu1 %1745, %v1865_v14   ;;  %1627 = vmatprep.mubr.msk.f32.mxu1 %vm605_vm0, %v1390_v38  ;;  %v238_v39 = vpop.permute.xlu0 %237 }
  0x98   : > { %v418_v40 = vpop.permute.xlu1 %417  ;;  %vm250_vm7 = vcmp.eq.s32.totalorder %v1919_v25, %v238_v39  ;;  %1585 = vmatprep.mubr.msk.f32.mxu0 %vm605_vm0, %v1362_v37 }
  0x99   : > { %vm438_vm8 = vcmp.eq.s32.totalorder %v1919_v25, %v418_v40  ;;  %v1363_v41 = vsel %vm250_vm7, 1.0, %v1784_v28 }
  0x9a   : > { %v1391_v42 = vsel %vm438_vm8, 1.0, %v1784_v28  ;;  %1586 = vmatmul.mubr.msk.f32.gmra.mxu0 %vm605_vm0, %v1363_v41 }
  0x9b   : > { %1746 = vset.pattern.permute.xlu1 %v1782_v22  ;;  %1628 = vmatmul.mubr.msk.f32.vlgmr.msra.gmra.mxu1 %vm605_vm0, %v1391_v42  ;;  %v241_v43 = vpop.permute.xlu0 %240 }
  0x9c   : > { %375 = vperm.xlu1 %1746, %v1841_v3   ;;  %v421_v44 = vpop.permute.xlu1 %420  ;;  %vm251_vm9 = vcmp.eq.s32.totalorder %v1919_v25, %v241_v43 }
  0x9d   : > { %vm439_vm10 = vcmp.eq.s32.totalorder %v1919_v25, %v421_v44  ;;  %v1364_v45 = vsel %vm251_vm9, 1.0, %v1784_v28 }
  0x9e   : > { %v1392_v46 = vsel %vm439_vm10, 1.0, %v1784_v28  ;;  %1588 = vmatprep.mubr.msk.f32.mxu0 %vm605_vm0, %v1364_v45 }
  0x9f   : > { %1630 = vmatprep.mubr.msk.f32.mxu1 %vm605_vm0, %v1392_v46  ;;  %v244_v47 = vpop.permute.xlu0 %243 }
  0xa0   : > { %378 = vperm.xlu1 %1746, %v1852_v8   ;;  %v424_v48 = vpop.permute.xlu1 %423  ;;  %vm252_vm11 = vcmp.eq.s32.totalorder %v1919_v25, %v244_v47 }
  0xa1   : > { %vm440_vm12 = vcmp.eq.s32.totalorder %v1919_v25, %v424_v48  ;;  %v1365_v49 = vsel %vm252_vm11, 1.0, %v1784_v28 }
  0xa2   : > { %v1393_v50 = vsel %vm440_vm12, 1.0, %v1784_v28  ;;  %1589 = vmatmul.mubr.msk.f32.gmra.mxu0 %vm605_vm0, %v1365_v49 }
  0xa3   : > { %1631 = vmatmul.mubr.msk.f32.gmra.mxu1 %vm605_vm0, %v1393_v50 }
  0xa4   : > { %1748 = vset.pattern.permute.xlu1 %v1783_v23  ;;  %v427_v51 = vpop.permute.xlu1 %426  ;;  %v430_v52 = vpop.permute.xlu0 %429 }
  0xa5   : > { %vm441_vm13 = vcmp.eq.s32.totalorder %v1919_v25, %v427_v51  ;;  %558 = vperm.xlu1 %1748, %v1836_v2   ;;  %vm442_vm14 = vcmp.eq.s32.totalorder %v1919_v25, %v430_v52 }
  0xa6   : > { %v1394_v53 = vsel %vm441_vm13, 1.0, %v1784_v28  ;;  %v1395_v54 = vsel %vm442_vm14, 1.0, %v1784_v28 }
  0xa7   : > { %1633 = vmatprep.mubr.msk.f32.mxu1 %vm605_vm0, %v1394_v53 }
  0xa8   : > { %1634 = vmatmul.mubr.msk.f32.gmra.mxu1 %vm605_vm0, %v1395_v54 }
  0xa9   : > { %561 = vperm.xlu1 %1748, %v1844_v4   ;;  %v274_v55 = vpop.permute.xlu1 %273  ;;  %v271_v56 = vpop.permute.xlu0 %270 }
  0xaa   : > { %vm294_vm15 = vcmp.eq.s32.totalorder %v1919_v25, %v274_v55  ;;  %vm293_vm1 = vcmp.eq.s32.totalorder %v1919_v25, %v271_v56 }
  0xab   : > { %v1367_v57 = vsel %vm294_vm15, 1.0, %v1784_v28  ;;  %v1366_v58 = vsel %vm293_vm1, 1.0, %v1784_v28 }
  0xac   : > { %1591 = vmatprep.mubr.msk.f32.mxu0 %vm605_vm0, %v1366_v58 }
  0xad   : > { %1749 = vset.pattern.permute.xlu1 %v1782_v22  ;;  %v277_v59 = vpop.permute.xlu1 %276  ;;  %1592 = vmatmul.mubr.msk.f32.gmra.mxu0 %vm605_vm0, %v1367_v57  ;;  %v280_v60 = vpop.permute.xlu0 %279 }
  0xae   : > { %vm295_vm2 = vcmp.eq.s32.totalorder %v1919_v25, %v277_v59  ;;  %384 = vperm.xlu1 %1749, %v1865_v14   ;;  %vm296_vm3 = vcmp.eq.s32.totalorder %v1919_v25, %v280_v60 }
  0xaf   : > { %v1368_v61 = vsel %vm295_vm2, 1.0, %v1784_v28  ;;  %v1369_v62 = vsel %vm296_vm3, 1.0, %v1784_v28 }
  0xb0   : > { %1594 = vmatprep.mubr.msk.f32.mxu0 %vm605_vm0, %v1368_v61 }
  0xb1   : > { %1595 = vmatmul.mubr.msk.f32.gmra.mxu0 %vm605_vm0, %v1369_v62  ;;  %v289_v63 = vpop.permute.xlu0 %288 }
  0xb2   : > { %387 = vperm.xlu1 %1749, %v1872_v17   ;;  %v433_v0 = vpop.permute.xlu1 %432  ;;  %vm299_vm8 = vcmp.eq.s32.totalorder %v1919_v25, %v289_v63 }
  0xb3   : > { %vm443_vm4 = vcmp.eq.s32.totalorder %v1919_v25, %v433_v0  ;;  %v1372_v9 = vsel %vm299_vm8, 1.0, %v1784_v28 }
  0xb4   : > { %v1396_v1 = vsel %vm443_vm4, 1.0, %v1784_v28 }
  0xb5   : > { %1636 = vmatprep.mubr.msk.f32.mxu1 %vm605_vm0, %v1396_v1 }
  0xb6   : > { %1751 = vset.pattern.permute.xlu1 %v1783_v23  ;;  %v436_v2 = vpop.permute.xlu1 %435  ;;  %v463_v4 = vpop.permute.xlu0 %462 }
  0xb7   : > { %vm444_vm5 = vcmp.eq.s32.totalorder %v1919_v25, %v436_v2  ;;  %567 = vperm.xlu1 %1751, %v1841_v3   ;;  %vm485_vm6 = vcmp.eq.s32.totalorder %v1919_v25, %v463_v4 }
  0xb8   : > { %v1397_v5 = vsel %vm444_vm5, 1.0, %v1784_v28  ;;  %v1398_v6 = vsel %vm485_vm6, 1.0, %v1784_v28 }
  0xb9   : > { %1637 = vmatmul.mubr.msk.f32.gmra.mxu1 %vm605_vm0, %v1397_v5 }
  0xba   : > { %1639 = vmatprep.mubr.msk.f32.mxu1 %vm605_vm0, %v1398_v6  ;;  %v472_v12 = vpop.permute.xlu0 %471 }
  0xbb   : > { %573 = vperm.xlu1 %1751, %v1858_v11   ;;  %v283_v7 = vpop.permute.xlu1 %282  ;;  %vm488_vm11 = vcmp.eq.s32.totalorder %v1919_v25, %v472_v12 }
  0xbc   : > { %vm297_vm7 = vcmp.eq.s32.totalorder %v1919_v25, %v283_v7  ;;  %v1401_v16 = vsel %vm488_vm11, 1.0, %v1784_v28 }
  0xbd   : > { %v1370_v8 = vsel %vm297_vm7, 1.0, %v1784_v28 }
  0xbe   : > { %1597 = vmatprep.mubr.msk.f32.mxu0 %vm605_vm0, %v1370_v8  ;;  %v481_v14 = vpop.permute.xlu0 %480 }
  0xbf   : > { %579 = vperm.xlu1 %1751, %v1872_v17   ;;  %v286_v3 = vpop.permute.xlu1 %285  ;;  %vm491_vm2 = vcmp.eq.s32.totalorder %v1919_v25, %v481_v14 }
  0xc0   : > { %vm298_vm9 = vcmp.eq.s32.totalorder %v1919_v25, %v286_v3  ;;  %v1404_v29 = vsel %vm491_vm2, 1.0, %v1784_v28 }
  0xc1   : > { %v1371_v10 = vsel %vm298_vm9, 1.0, %v1784_v28 }
  0xc2   : > { %1598 = vmatmul.mubr.msk.f32.gmra.mxu0 %vm605_vm0, %v1371_v10 }
  0xc3   : > { %1600 = vmatprep.mubr.msk.f32.mxu0 %vm605_vm0, %v1372_v9  ;;  %v322_v19 = vpop.permute.xlu0 %321 }
  0xc4   : > { %v466_v11 = vpop.permute.xlu1 %465  ;;  %vm342_vm14 = vcmp.eq.s32.totalorder %v1919_v25, %v322_v19 }
  0xc5   : > { %vm486_vm10 = vcmp.eq.s32.totalorder %v1919_v25, %v466_v11  ;;  %v1375_v22 = vsel %vm342_vm14, 1.0, %v1784_v28 }
  0xc6   : > { %v1399_v13 = vsel %vm486_vm10, 1.0, %v1784_v28 }
  0xc7   : > { %1640 = vmatmul.mubr.msk.f32.gmra.mxu1 %vm605_vm0, %v1399_v13  ;;  %v331_v31 = vpop.permute.xlu0 %330 }
  0xc8   : > { %v469_v15 = vpop.permute.xlu1 %468  ;;  %vm345_vm5 = vcmp.eq.s32.totalorder %v1919_v25, %v331_v31 }
  0xc9   : > { %vm487_vm12 = vcmp.eq.s32.totalorder %v1919_v25, %v469_v15  ;;  %v1378_v36 = vsel %vm345_vm5, 1.0, %v1784_v28 }
  0xca   : > { %v1400_v17 = vsel %vm487_vm12, 1.0, %v1784_v28 }
  0xcb   : > { %1642 = vmatprep.mubr.msk.f32.mxu1 %vm605_vm0, %v1400_v17  ;;  %v340_v34 = vpop.permute.xlu0 %339 }
  0xcc   : > { %1643 = vmatmul.mubr.msk.f32.gmra.mxu1 %vm605_vm0, %v1401_v16  ;;  %vm348_vm11 = vcmp.eq.s32.totalorder %v1919_v25, %v340_v34 }
  0xcd   : > { %v292_v18 = vpop.permute.xlu1 %291  ;;  %v1381_v47 = vsel %vm348_vm11, 1.0, %v1784_v28 }
  0xce   : > { %vm300_vm13 = vcmp.eq.s32.totalorder %v1919_v25, %v292_v18 }
  0xcf   : > { %v1373_v20 = vsel %vm300_vm13, 1.0, %v1784_v28 }
  0xd0   : > { %1601 = vmatmul.mubr.msk.f32.gmra.mxu0 %vm605_vm0, %v1373_v20  ;;  %v514_v39 = vpop.permute.xlu0 %513 }
  0xd1   : > { %vm534_vm8 = vcmp.eq.s32.totalorder %v1919_v25, %v514_v39 }
  0xd2   : > { %v319_v21 = vpop.permute.xlu1 %318  ;;  %v1407_v42 = vsel %vm534_vm8, 1.0, %v1784_v28 }
  0xd3   : > { %vm341_vm15 = vcmp.eq.s32.totalorder %v1919_v25, %v319_v21 }
  0xd4   : > { %v1374_v23 = vsel %vm341_vm15, 1.0, %v1784_v28  ;;  %v523_v48 = vpop.permute.xlu0 %522 }
  0xd5   : > { %1603 = vmatprep.mubr.msk.f32.mxu0 %vm605_vm0, %v1374_v23  ;;  %vm537_vm14 = vcmp.eq.s32.totalorder %v1919_v25, %v523_v48 }
  0xd6   : > { %1604 = vmatmul.mubr.msk.f32.gmra.mxu0 %vm605_vm0, %v1375_v22  ;;  %v1410_v54 = vsel %vm537_vm14, 1.0, %v1784_v28 }
  0xd7   : > { %v475_v24 = vpop.permute.xlu1 %474 }
  0xd8   : > { %vm489_vm1 = vcmp.eq.s32.totalorder %v1919_v25, %v475_v24  ;;  %v532_v52 = vpop.permute.xlu0 %531 }
  0xd9   : > { %v1402_v26 = vsel %vm489_vm1, 1.0, %v1784_v28  ;;  %vm540_vm5 = vcmp.eq.s32.totalorder %v1919_v25, %v532_v52 }
  0xda   : > { %1645 = vmatprep.mubr.msk.f32.mxu1 %vm605_vm0, %v1402_v26  ;;  %v1413_v1 = vsel %vm540_vm5, 1.0, %v1784_v28 }
  0xdb   : > { %v478_v27 = vpop.permute.xlu1 %477 }
  0xdc   : > { %vm490_vm3 = vcmp.eq.s32.totalorder %v1919_v25, %v478_v27 }
  0xdd   : > { %v1403_v30 = vsel %vm490_vm3, 1.0, %v1784_v28  ;;  %v373_v56 = vpop.permute.xlu0 %372 }
  0xde   : > { %1646 = vmatmul.mubr.msk.f32.gmra.mxu1 %vm605_vm0, %v1403_v30  ;;  %vm391_vm2 = vcmp.eq.s32.totalorder %v1919_v25, %v373_v56 }
  0xdf   : > { %1648 = vmatprep.mubr.msk.f32.mxu1 %vm605_vm0, %v1404_v29  ;;  %v1384_v60 = vsel %vm391_vm2, 1.0, %v1784_v28 }
  0xe0   : > { %v325_v32 = vpop.permute.xlu1 %324 }
  0xe1   : > { %vm343_vm4 = vcmp.eq.s32.totalorder %v1919_v25, %v325_v32  ;;  %v382_v4 = vpop.permute.xlu0 %381 }
  0xe2   : > { %v1376_v33 = vsel %vm343_vm4, 1.0, %v1784_v28  ;;  %vm394_vm8 = vcmp.eq.s32.totalorder %v1919_v25, %v382_v4 }
  0xe3   : > { %1606 = vmatprep.mubr.msk.f32.mxu0 %vm605_vm0, %v1376_v33  ;;  %v1387_v8 = vsel %vm394_vm8, 1.0, %v1784_v28 }
  0xe4   : > { %v328_v35 = vpop.permute.xlu1 %327 }
  0xe5   : > { %vm344_vm6 = vcmp.eq.s32.totalorder %v1919_v25, %v328_v35 }
  0xe6   : > { %v1377_v37 = vsel %vm344_vm6, 1.0, %v1784_v28  ;;  %v565_v10 = vpop.permute.xlu0 %564 }
  0xe7   : > { %1607 = vmatmul.mubr.msk.f32.gmra.mxu0 %vm605_vm0, %v1377_v37  ;;  %vm583_vm11 = vcmp.eq.s32.totalorder %v1919_v25, %v565_v10 }
  0xe8   : > { %1609 = vmatprep.mubr.msk.f32.mxu0 %vm605_vm0, %v1378_v36  ;;  %v1416_v13 = vsel %vm583_vm11, 1.0, %v1784_v28 }
  0xe9   : > { %v484_v38 = vpop.permute.xlu1 %483 }
  0xea   : > { %vm492_vm7 = vcmp.eq.s32.totalorder %v1919_v25, %v484_v38  ;;  %v571_v18 = vpop.permute.xlu0 %570 }
  0xeb   : > { %v1405_v40 = vsel %vm492_vm7, 1.0, %v1784_v28 }
  0xec   : > { %1649 = vmatmul.mubr.msk.f32.gmra.mxu1 %vm605_vm0, %v1405_v40 }
  0xee   : > { %v511_v41 = vpop.permute.xlu1 %510  ;;  %v577_v21 = vpop.permute.xlu0 %576 }
  0xef   : > { %vm533_vm9 = vcmp.eq.s32.totalorder %v1919_v25, %v511_v41  ;;  %vm587_vm2 = vcmp.eq.s32.totalorder %v1919_v25, %v577_v21 }
  0xf0   : > { %v1406_v43 = vsel %vm533_vm9, 1.0, %v1784_v28  ;;  %v1420_v27 = vsel %vm587_vm2, 1.0, %v1784_v28 }
  0xf1   : > { %1651 = vmatprep.mubr.msk.f32.mxu1 %vm605_vm0, %v1406_v43 }
  0xf2   : > { %1652 = vmatmul.mubr.msk.f32.gmra.mxu1 %vm605_vm0, %v1407_v42 }
  0xf3   : > { %v334_v44 = vpop.permute.xlu1 %333 }
  0xf4   : > { %vm346_vm10 = vcmp.eq.s32.totalorder %v1919_v25, %v334_v44 }
  0xf5   : > { %v1379_v45 = vsel %vm346_vm10, 1.0, %v1784_v28 }
  0xf6   : > { %1610 = vmatmul.mubr.msk.f32.gmra.mxu0 %vm605_vm0, %v1379_v45 }
  0xf7   : > { %v337_v46 = vpop.permute.xlu1 %336 }
  0xf8   : > { %vm347_vm12 = vcmp.eq.s32.totalorder %v1919_v25, %v337_v46 }
  0xf9   : > { %v1380_v49 = vsel %vm347_vm12, 1.0, %v1784_v28 }
  0xfa   : > { %1612 = vmatprep.mubr.msk.f32.mxu0 %vm605_vm0, %v1380_v49 }
  0xfb   : > { %1613 = vmatmul.mubr.msk.f32.gmra.mxu0 %vm605_vm0, %v1381_v47 }
  0xfc   : > { %v517_v50 = vpop.permute.xlu1 %516 }
  0xfd   : > { %vm535_vm13 = vcmp.eq.s32.totalorder %v1919_v25, %v517_v50 }
  0xfe   : > { %v1408_v51 = vsel %vm535_vm13, 1.0, %v1784_v28 }
  0xff   : > { %1654 = vmatprep.mubr.msk.f32.mxu1 %vm605_vm0, %v1408_v51 }
 0x100   : > { %v520_v53 = vpop.permute.xlu1 %519 }
 0x101   : > { %vm536_vm15 = vcmp.eq.s32.totalorder %v1919_v25, %v520_v53 }
 0x102   : > { %v1409_v55 = vsel %vm536_vm15, 1.0, %v1784_v28  ;;  %vm585_vm15 = vcmp.eq.s32.totalorder %v1919_v25, %v571_v18 }
 0x103   : > { %1655 = vmatmul.mubr.msk.f32.gmra.mxu1 %vm605_vm0, %v1409_v55  ;;  %v1418_v23 = vsel %vm585_vm15, 1.0, %v1784_v28 }
 0x104   : > { %1657 = vmatprep.mubr.msk.f32.mxu1 %vm605_vm0, %v1410_v54 }
 0x105   : > { %v367_v57 = vpop.permute.xlu1 %366 }
 0x106   : > { %vm389_vm1 = vcmp.eq.s32.totalorder %v1919_v25, %v367_v57 }
 0x107   : > { %v1382_v58 = vsel %vm389_vm1, 1.0, %v1784_v28 }
 0x108   : > { %1615 = vmatprep.mubr.msk.f32.mxu0 %vm605_vm0, %v1382_v58 }
 0x109   : > { %v370_v59 = vpop.permute.xlu1 %369 }
 0x10a   : > { %vm390_vm3 = vcmp.eq.s32.totalorder %v1919_v25, %v370_v59 }
 0x10b   : > { %v1383_v61 = vsel %vm390_vm3, 1.0, %v1784_v28 }
 0x10c   : > { %1616 = vmatmul.mubr.msk.f32.gmra.mxu0 %vm605_vm0, %v1383_v61 }
 0x10d   : > { %1618 = vmatprep.mubr.msk.f32.mxu0 %vm605_vm0, %v1384_v60 }
 0x10e   : > { %v526_v62 = vpop.permute.xlu1 %525 }
 0x10f   : > { %vm538_vm4 = vcmp.eq.s32.totalorder %v1919_v25, %v526_v62 }
 0x110   : > { %v1411_v63 = vsel %vm538_vm4, 1.0, %v1784_v28 }
 0x111   : > { %1658 = vmatmul.mubr.msk.f32.gmra.mxu1 %vm605_vm0, %v1411_v63 }
 0x112   : > { %v529_v0 = vpop.permute.xlu1 %528 }
 0x113   : > { %vm539_vm6 = vcmp.eq.s32.totalorder %v1919_v25, %v529_v0 }
 0x114   : > { %v1412_v2 = vsel %vm539_vm6, 1.0, %v1784_v28 }
 0x115   : > { %1660 = vmatprep.mubr.msk.f32.mxu1 %vm605_vm0, %v1412_v2 }
 0x116   : > { %1661 = vmatmul.mubr.msk.f32.gmra.mxu1 %vm605_vm0, %v1413_v1 }
 0x117   : > { %v376_v5 = vpop.permute.xlu1 %375 }
 0x118   : > { %vm392_vm7 = vcmp.eq.s32.totalorder %v1919_v25, %v376_v5 }
 0x119   : > { %v1385_v6 = vsel %vm392_vm7, 1.0, %v1784_v28 }
 0x11a   : > { %1619 = vmatmul.mubr.msk.f32.gmra.mxu0 %vm605_vm0, %v1385_v6 }
 0x11b   : > { %v379_v7 = vpop.permute.xlu1 %378 }
 0x11c   : > { %vm393_vm9 = vcmp.eq.s32.totalorder %v1919_v25, %v379_v7 }
 0x11d   : > { %v1386_v3 = vsel %vm393_vm9, 1.0, %v1784_v28 }
 0x11e   : > { %1621 = vmatprep.mubr.msk.f32.mxu0 %vm605_vm0, %v1386_v3 }
 0x11f   : > { %1622 = vmatmul.mubr.msk.f32.gmra.mxu0 %vm605_vm0, %v1387_v8 }
 0x120   : > { %v559_v9 = vpop.permute.xlu1 %558 }
 0x121   : > { %vm581_vm10 = vcmp.eq.s32.totalorder %v1919_v25, %v559_v9 }
 0x122   : > { %v1414_v12 = vsel %vm581_vm10, 1.0, %v1784_v28 }
 0x123   : > { %1663 = vmatprep.mubr.msk.f32.mxu1 %vm605_vm0, %v1414_v12 }
 0x124   : > { %v562_v11 = vpop.permute.xlu1 %561 }
 0x125   : > { %vm582_vm12 = vcmp.eq.s32.totalorder %v1919_v25, %v562_v11 }
 0x126   : > { %v1415_v14 = vsel %vm582_vm12, 1.0, %v1784_v28 }
 0x127   : > { %1664 = vmatmul.mubr.msk.f32.gmra.mxu1 %vm605_vm0, %v1415_v14 }
 0x128   : > { %1666 = vmatprep.mubr.msk.f32.mxu1 %vm605_vm0, %v1416_v13 }
 0x129   : > { %v385_v15 = vpop.permute.xlu1 %384 }
 0x12a   : > { %vm395_vm13 = vcmp.eq.s32.totalorder %v1919_v25, %v385_v15 }
 0x12b   : > { %v1388_v16 = vsel %vm395_vm13, 1.0, %v1784_v28 }
 0x12c   : > { %1624 = vmatprep.mubr.msk.f32.mxu0 %vm605_vm0, %v1388_v16 }
 0x12d   : > { %v388_v17 = vpop.permute.xlu1 %387 }
 0x12e   : > { %vm396_vm14 = vcmp.eq.s32.totalorder %v1919_v25, %v388_v17 }
 0x12f   : > { %v1389_v19 = vsel %vm396_vm14, 1.0, %v1784_v28 }
 0x130   : > { %1625 = vmatmul.mubr.msk.f32.gmra.mxu0 %vm605_vm0, %v1389_v19 }
 0x132   : > { %v568_v20 = vpop.permute.xlu1 %567 }
 0x133   : > { %vm584_vm1 = vcmp.eq.s32.totalorder %v1919_v25, %v568_v20 }
 0x134   : > { %v1417_v22 = vsel %vm584_vm1, 1.0, %v1784_v28 }
 0x135   : > { %1667 = vmatmul.mubr.msk.f32.gmra.mxu1 %vm605_vm0, %v1417_v22 }
 0x136   : > { %v574_v24 = vpop.permute.xlu1 %573  ;;  %1669 = vmatprep.mubr.msk.f32.mxu1 %vm605_vm0, %v1418_v23 }
 0x137   : > { %vm586_vm3 = vcmp.eq.s32.totalorder %v1919_v25, %v574_v24 }
 0x138   : > { %v1419_v26 = vsel %vm586_vm3, 1.0, %v1784_v28 }
 0x139   : > { %1670 = vmatmul.mubr.msk.f32.gmra.mxu1 %vm605_vm0, %v1419_v26 }
 0x13a   : > { %v580_v29 = vpop.permute.xlu1 %579  ;;  %1672 = vmatprep.mubr.msk.f32.mxu1 %vm605_vm0, %v1420_v27 }
 0x13b   : > { %vm588_vm4 = vcmp.eq.s32.totalorder %v1919_v25, %v580_v29 }
 0x13c   : > { %v1421_v30 = vsel %vm588_vm4, 1.0, %v1784_v28 }
 0x13d   : > { %1673 = vmatmul.mubr.msk.f32.gmra.mxu1 %vm605_vm0, %v1421_v30  ;;  %vm1239_vm0 = vcmask 261120  }
 0x152   : > { %v1581_v31 = vpop.f32.mrf.mxu0 }
 0x154   : > { %v864_v32 = vpop.f32.mrf.mxu0 }
 0x156   : > { %v2129_v33 = vpop.f32.mrf.mxu0 }
 0x158   : > { %v2131_v34 = vpop.f32.mrf.mxu0 }
 0x15a   : > { %v2133_v35 = vpop.f32.mrf.mxu0 }
 0x15b   : > { %v1629_v37 = vpop.f32.mrf.mxu1 }
 0x15c   : > { %v2135_v36 = vpop.f32.mrf.mxu0 }
 0x15d   : > { %v1024_v39 = vpop.f32.mrf.mxu1 }
 0x162   : > { %v2137_v38 = vpop.f32.mrf.mxu0 }
 0x163   : > { %v2141_v25 = vpop.f32.mrf.mxu1 }
 0x164   : > { %v2139_v40 = vpop.f32.mrf.mxu0 }
 0x165   : > { %v2143_v41 = vpop.f32.mrf.mxu1 }
 0x168   : > { %v2145_v43 = vpop.f32.mrf.mxu1 }
 0x16a   : > { %v2147_v45 = vpop.f32.mrf.mxu1 }
 0x16d   : > { %v1593_v28 = vpop.f32.mrf.mxu0 }
 0x16e   : > { %v1184_v9 = vmax.f32 %v1581_v31, %v1593_v28 }
 0x16f   : > { %v904_v42 = vpop.f32.mrf.mxu0 }
 0x170   : > { %v1183_v10 = vmax.f32 %v864_v32, %v904_v42 }
 0x171   : > { %v1596_v44 = vpop.f32.mrf.mxu0 }
 0x172   : > { %v1186_v26 = vmax.f32 %v2129_v33, %v1596_v44 }
 0x173   : > { %v914_v46 = vpop.f32.mrf.mxu0 }
 0x174   : > { %v1185_v30 = vmax.f32 %v2131_v34, %v914_v46 }
 0x179   : > { %v2149_v47 = vpop.f32.mrf.mxu1 }
 0x17b   : > { %v2151_v49 = vpop.f32.mrf.mxu1 }
 0x182   : > { %v1599_v48 = vpop.f32.mrf.mxu0 }
 0x183   : > { %v1188_v28 = vmax.f32 %v2133_v35, %v1599_v48 }
 0x184   : > { %v924_v50 = vpop.f32.mrf.mxu0 }
 0x185   : > { %v1187_v34 = vmax.f32 %v2135_v36, %v924_v50 }
 0x187   : > { %v1641_v51 = vpop.f32.mrf.mxu1 }
 0x189   : > { %v1064_v53 = vpop.f32.mrf.mxu1 }
 0x18c   : > { %v2157_v55 = vpop.f32.mrf.mxu1 }
 0x18e   : > { %v2159_v57 = vpop.f32.mrf.mxu1 }
 0x190   : > { %v2153_v52 = vpop.f32.mrf.mxu0 }
 0x192   : > { %v2155_v54 = vpop.f32.mrf.mxu0 }
 0x193   : > { %v1189_v36 = vmax.f32 %v2139_v40, %v2155_v54 }
 0x196   : > { %v1605_v56 = vpop.f32.mrf.mxu0 }
 0x197   : > { %v1192_v12 = vmax.f32 %v1184_v9, %v1605_v56 }
 0x198   : > { %v944_v58 = vpop.f32.mrf.mxu0 }
 0x199   : > { %v1191_v14 = vmax.f32 %v1183_v10, %v944_v58 }
 0x19e   : > { %v2161_v59 = vpop.f32.mrf.mxu1 }
 0x1a0   : > { %v2163_v61 = vpop.f32.mrf.mxu1 }
 0x1a7   : > { %v1608_v60 = vpop.f32.mrf.mxu0 }
 0x1a8   : > { %v1194_v31 = vmax.f32 %v1186_v26, %v1608_v60 }
 0x1a9   : > { %v954_v62 = vpop.f32.mrf.mxu0 }
 0x1aa   : > { %v1193_v33 = vmax.f32 %v1185_v30, %v954_v62  ;;  %v1190_v62 = vmax.f32 %v2137_v38, %v2153_v52 }
 0x1ac   : > { %v2165_v63 = vpop.f32.mrf.mxu1 }
 0x1ae   : > { %v2167_v1 = vpop.f32.mrf.mxu1 }
 0x1b2   : > { %v1653_v4 = vpop.f32.mrf.mxu1 }
 0x1b4   : > { %v1104_v6 = vpop.f32.mrf.mxu1 }
 0x1b6   : > { %v1611_v0 = vpop.f32.mrf.mxu0 }
 0x1b7   : > { %v1196_v46 = vmax.f32 %v1188_v28, %v1611_v0 }
 0x1b8   : > { %v964_v2 = vpop.f32.mrf.mxu0 }
 0x1b9   : > { %v1195_v58 = vmax.f32 %v1187_v34, %v964_v2 }
 0x1bb   : > { %v1614_v5 = vpop.f32.mrf.mxu0 }
 0x1bc   : > { %v1198_v50 = vmax.f32 %v1190_v62, %v1614_v5 }
 0x1bd   : > { %v974_v7 = vpop.f32.mrf.mxu0 }
 0x1c3   : > { %v1656_v8 = vpop.f32.mrf.mxu1 }
 0x1c5   : > { %v1114_v11 = vpop.f32.mrf.mxu1 }
 0x1cc   : > { %v1617_v3 = vpop.f32.mrf.mxu0 }
 0x1cd   : > { %v1200_v15 = vmax.f32 %v1192_v12, %v1617_v3 }
 0x1ce   : > { %v984_v13 = vpop.f32.mrf.mxu0 }
 0x1cf   : > { %v1199_v17 = vmax.f32 %v1191_v14, %v984_v13  ;;  %v1208_v18 = vmax.f32 %v1200_v15, %v1629_v37 }
 0x1d1   : > { %v1659_v16 = vpop.f32.mrf.mxu1  ;;  %v1207_v21 = vmax.f32 %v1199_v17, %v1024_v39  ;;  %v1216_v23 = vmax.f32 %v1208_v18, %v1641_v51 }
 0x1d3   : > { %v1124_v19 = vpop.f32.mrf.mxu1  ;;  %v1215_v27 = vmax.f32 %v1207_v21, %v1064_v53  ;;  %v1224_v32 = vmax.f32 %v1216_v23, %v1653_v4 }
 0x1d5   : > { %v1223_v51 = vmax.f32 %v1215_v27, %v1104_v6 }
 0x1d6   : > { %v2169_v22 = vpop.f32.mrf.mxu1 }
 0x1d8   : > { %v2172_v29 = vpop.f32.mrf.mxu1 }
 0x1da   : > { %v1620_v20 = vpop.f32.mrf.mxu0 }
 0x1db   : > { %v1202_v39 = vmax.f32 %v1194_v31, %v1620_v20 }
 0x1dc   : > { %v994_v24 = vpop.f32.mrf.mxu0 }
 0x1dd   : > { %v1201_v56 = vmax.f32 %v1193_v33, %v994_v24  ;;  %v1210_v60 = vmax.f32 %v1202_v39, %v2141_v25  ;;  %v1197_v25 = vmax.f32 %v1189_v36, %v974_v7 }
 0x1df   : > { %v1623_v42 = vpop.f32.mrf.mxu0  ;;  %v1209_v6 = vmax.f32 %v1201_v56, %v2143_v41  ;;  %v1218_v2 = vmax.f32 %v1210_v60, %v2157_v55 }
 0x1e0   : > { %v1204_v4 = vmax.f32 %v1196_v46, %v1623_v42 }
 0x1e1   : > { %v1004_v48 = vpop.f32.mrf.mxu0  ;;  %v1217_v38 = vmax.f32 %v1209_v6, %v2159_v57  ;;  %v1226_v14 = vmax.f32 %v1218_v2, %v1656_v8 }
 0x1e2   : > { %v1203_v3 = vmax.f32 %v1195_v58, %v1004_v48  ;;  %v1212_v0 = vmax.f32 %v1204_v4, %v2145_v43 }
 0x1e3   : > { %v1225_v5 = vmax.f32 %v1217_v38, %v1114_v11 }
 0x1e4   : > { %v1211_v12 = vmax.f32 %v1203_v3, %v2147_v45  ;;  %v1220_v40 = vmax.f32 %v1212_v0, %v2161_v59 }
 0x1e6   : > { %v1219_v7 = vmax.f32 %v1211_v12, %v2163_v61  ;;  %v1228_v15 = vmax.f32 %v1220_v40, %v1659_v16 }
 0x1e7   : > { %v1665_v37 = vpop.f32.mrf.mxu1 }
 0x1e8   : > { %v1232_v44 = vmax.f32 %v1224_v32, %v1665_v37  ;;  %v1227_v17 = vmax.f32 %v1219_v7, %v1124_v19 }
 0x1e9   : > { %v1144_v53 = vpop.f32.mrf.mxu1 }
 0x1ea   : > { %1241 = vst.msk [vmem:[%s2180_s22 + $0x8] sm:$0xff] %vm1239_vm0, %v1232_v44  ;;  %v1231_v35 = vmax.f32 %v1223_v51, %v1144_v53 }
 0x1ec   : > { %1240 = vst.msk [vmem:[%s2180_s22] sm:$0xff] %vm1239_vm0, %v1231_v35 }
 0x1f0   : > { %v1626_v9 = vpop.f32.mrf.mxu0 }
 0x1f1   : > { %v1206_v10 = vmax.f32 %v1198_v50, %v1626_v9 }
 0x1f2   : > { %v1014_v13 = vpop.f32.mrf.mxu0 }
 0x1f3   : > { %v1205_v41 = vmax.f32 %v1197_v25, %v1014_v13  ;;  %v1214_v52 = vmax.f32 %v1206_v10, %v2149_v47 }
 0x1f5   : > { %v1668_v54 = vpop.f32.mrf.mxu1  ;;  %v1213_v43 = vmax.f32 %v1205_v41, %v2151_v49  ;;  %v1222_v47 = vmax.f32 %v1214_v52, %v2165_v63 }
 0x1f6   : > { %v1234_v55 = vmax.f32 %v1226_v14, %v1668_v54 }
 0x1f7   : > { %v1154_v45 = vpop.f32.mrf.mxu1  ;;  %v1221_v49 = vmax.f32 %v1213_v43, %v2167_v1  ;;  %v1230_v18 = vmax.f32 %v1222_v47, %v2169_v22 }
 0x1f8   : > { %1243 = vst.msk [vmem:[%s2180_s22 + $0x18] sm:$0xff] %vm1239_vm0, %v1234_v55  ;;  %v1233_v57 = vmax.f32 %v1225_v5, %v1154_v45 }
 0x1f9   : > { %v1671_v8 = vpop.f32.mrf.mxu1  ;;  %v1229_v63 = vmax.f32 %v1221_v49, %v2172_v29 }
 0x1fa   : > { %1242 = vst.msk [vmem:[%s2180_s22 + $0x10] sm:$0xff] %vm1239_vm0, %v1233_v57  ;;  %v1236_v59 = vmax.f32 %v1228_v15, %v1671_v8 }
 0x1fb   : > { %v1164_v11 = vpop.f32.mrf.mxu1 }
 0x1fc   : > { %1245 = vst.msk [vmem:[%s2180_s22 + $0x28] sm:$0xff] %vm1239_vm0, %v1236_v59  ;;  %v1235_v61 = vmax.f32 %v1227_v17, %v1164_v11 }
 0x1fd   : > { %v1674_v20 = vpop.f32.mrf.mxu1 }
 0x1fe   : > { %1244 = vst.msk [vmem:[%s2180_s22 + $0x20] sm:$0xff] %vm1239_vm0, %v1235_v61  ;;  %v1238_v16 = vmax.f32 %v1230_v18, %v1674_v20 }
 0x1ff   : > { %v1174_v21 = vpop.f32.mrf.mxu1 }
 0x200   : > { %1247 = vst.msk [vmem:[%s2180_s22 + $0x38] sm:$0xff] %vm1239_vm0, %v1238_v16  ;;  %v1237_v23 = vmax.f32 %v1229_v63, %v1174_v21 }
 0x202   : > { %1246 = vst.msk [vmem:[%s2180_s22 + $0x30] sm:$0xff] %vm1239_vm0, %v1237_v23 }
 0x203 PF: > { %s12_s11 = sadd.s32 1, %s1774_s11   ;;  %s2229_s9 = smov %s1770_s10 }
 0x204   : > { %p9_p5 = scmp.ge.s32.totalorder %s12_s11, 4   ;;  %s2230_s10 = smov %s2232_s12 }
 0x206   :  { %11 = sbr.rel (!%p9_p5) target bundleno = 2 (0x2), region = 61 }

</bundles_post_ra>
